<compile_context>
chip_gen: v5e
topology: v5e:2x2
jax: 0.10.0
libtpu: 0.0.40
codegen_flags: <defaults>
</compile_context>

<pallas_src>
import functools

import jax
import jax.numpy as jnp
from jax.experimental import pallas as pl
from jax.experimental.pallas import tpu as pltpu


def _fc_network_kernel(x_ref, w1_ref, b1_ref, w2_ref, b2_ref, o_ref):
    """Fused fc1 -> ReLU -> fc2 on one batch tile.

    x_ref : (TB, Din)      VMEM
    w1_ref: (Din, Dhid)    VMEM (pre-transposed from PyTorch layout)
    b1_ref: (1, Dhid)      VMEM
    w2_ref: (Dhid, Dout)   VMEM (pre-transposed from PyTorch layout)
    b2_ref: (1, Dout)      VMEM
    o_ref : (TB, Dout)     VMEM
    """
    h = jnp.dot(x_ref[...], w1_ref[...], preferred_element_type=jnp.float32)
    h = jnp.maximum(h + b1_ref[...], 0.0)
    out = jnp.dot(h, w2_ref[...], preferred_element_type=jnp.float32)
    o_ref[...] = (out + b2_ref[...]).astype(o_ref.dtype)


def _round_up(x, m):
    return ((x + m - 1) // m) * m


@jax.jit
def fc_network_forward(params, x):
    """Single fused, jitted pallas_call for the whole 2-layer MLP."""
    w1, b1, w2, b2 = params["w1"], params["b1"], params["w2"], params["b2"]
    batch = x.shape[0]
    din, dhid = w1.shape
    dout = w2.shape[1]

    # Batch tile: multiple of 8 (sublane), capped at 128 rows per grid step.
    tb = min(128, _round_up(batch, 8))
    b_pad = _round_up(batch, tb)
    if b_pad != batch:
        x = jnp.pad(x, ((0, b_pad - batch), (0, 0)))

    out = pl.pallas_call(
        _fc_network_kernel,
        out_shape=jax.ShapeDtypeStruct((b_pad, dout), x.dtype),
        grid_spec=pltpu.PrefetchScalarGridSpec(
            num_scalar_prefetch=0,
            grid=(b_pad // tb,),
            in_specs=[
                pl.BlockSpec((tb, din), lambda i: (i, 0)),     # x tile
                pl.BlockSpec((din, dhid), lambda i: (0, 0)),   # w1 (resident)
                pl.BlockSpec((1, dhid), lambda i: (0, 0)),     # b1 (resident)
                pl.BlockSpec((dhid, dout), lambda i: (0, 0)),  # w2 (resident)
                pl.BlockSpec((1, dout), lambda i: (0, 0)),     # b2 (resident)
            ],
            out_specs=pl.BlockSpec((tb, dout), lambda i: (i, 0)),
        ),
        compiler_params=pltpu.CompilerParams(
            dimension_semantics=("parallel",),
        ),
    )(x, w1, b1, w2, b2)

    return out[:batch] if b_pad != batch else out
    # TODO(synk): if Din/Dhid ever grow beyond VMEM, add a K-reduction grid axis
    # ("arbitrary") with an f32 accumulator scratch.


def init_fc_params(key, input_size, hidden_size, output_size):
    """PyTorch nn.Linear default init: U(-1/sqrt(fan_in), +1/sqrt(fan_in)).

    Weights are sampled in PyTorch (out, in) layout for semantic parity, then
    transposed ONCE to (in, out); biases stored as (1, out).
    """

    def linear(k, fan_in, fan_out):
        kw, kb = jax.random.split(k)
        bound = 1.0 / jnp.sqrt(jnp.float32(fan_in))
        w = jax.random.uniform(kw, (fan_out, fan_in), jnp.float32, -bound, bound)
        b = jax.random.uniform(kb, (fan_out,), jnp.float32, -bound, bound)
        return w.T, b.reshape(1, fan_out)

    k1, k2 = jax.random.split(key)
    w1, b1 = linear(k1, input_size, hidden_size)
    w2, b2 = linear(k2, hidden_size, output_size)
    return {"w1": w1, "b1": b1, "w2": w2, "b2": b2}


def _reference(params, x):
    h = jnp.maximum(x @ params["w1"] + params["b1"], 0.0)
    return h @ params["w2"] + params["b2"]


if __name__ == "__main__":
    key = jax.random.PRNGKey(0)
    key, kx1, kx2 = jax.random.split(key, 3)

    # Small shapes consistent with FCNetwork.forward.
    batch = 8
    input_size = 32
    hidden_size = 64
    output_size = 16

    params = init_fc_params(key, input_size, hidden_size, output_size)

    # Case 1: small batch (single grid step, full-extent block).
    x1 = jax.random.normal(kx1, (batch, input_size), jnp.float32)
    out1 = jax.block_until_ready(fc_network_forward(params, x1))
    ref1 = _reference(params, x1)
    assert out1.shape == (batch, output_size)
    assert jnp.allclose(out1, ref1, atol=1e-5, rtol=1e-5)

    # Case 2: larger, non-aligned batch (exercises padding + batch grid).
    x2 = jax.random.normal(kx2, (200, input_size), jnp.float32)
    out2 = jax.block_until_ready(fc_network_forward(params, x2))
    ref2 = _reference(params, x2)
    assert out2.shape == (200, output_size)
    assert jnp.allclose(out2, ref2, atol=1e-5, rtol=1e-5)

    print("KERNEL_OK")
</pallas_src>

<mosaic_0001>
module attributes {stable_mosaic.version = 11 : i64} {
  func.func @_fc_network_kernel(%arg0: i32, %arg1: memref<8x32xf32, #tpu.memory_space<vmem>>, %arg2: memref<32x64xf32, #tpu.memory_space<vmem>>, %arg3: memref<1x64xf32, #tpu.memory_space<vmem>>, %arg4: memref<64x16xf32, #tpu.memory_space<vmem>>, %arg5: memref<1x16xf32, #tpu.memory_space<vmem>>, %arg6: memref<8x16xf32, #tpu.memory_space<vmem>>) attributes {dimension_semantics = [#tpu.dimension_semantics<parallel>], iteration_bounds = array<i64: 1>, scalar_prefetch = 0 : i64, scratch_operands = 0 : i64, tpu.core_type = #tpu.core_type<tc>, window_params = [{transform_indices = @transform_0, window_bounds = array<i64: 8, 32>}, {pipeline_mode = #tpu.pipeline_mode<synchronous>, transform_indices = @transform_1, window_bounds = array<i64: 32, 64>}, {pipeline_mode = #tpu.pipeline_mode<synchronous>, transform_indices = @transform_2, window_bounds = array<i64: 1, 64>}, {pipeline_mode = #tpu.pipeline_mode<synchronous>, transform_indices = @transform_3, window_bounds = array<i64: 64, 16>}, {pipeline_mode = #tpu.pipeline_mode<synchronous>, transform_indices = @transform_4, window_bounds = array<i64: 1, 16>}, {transform_indices = @transform_5, window_bounds = array<i64: 8, 16>}]} {
    %c0 = arith.constant 0 : index
    %c0_0 = arith.constant 0 : index
    %0 = vector.load %arg1[%c0, %c0_0] : memref<8x32xf32, #tpu.memory_space<vmem>>, vector<8x32xf32>
    %c0_1 = arith.constant 0 : index
    %c0_2 = arith.constant 0 : index
    %1 = vector.load %arg2[%c0_1, %c0_2] : memref<32x64xf32, #tpu.memory_space<vmem>>, vector<32x64xf32>
    %cst = arith.constant dense<0.000000e+00> : vector<8x64xf32>
    %2 = tpu.matmul %0, %1, %cst {dimension_numbers = #tpu.dot_dimension_numbers<[1], [0], [0], [1], [0, 0, 1, 1], [], []>} : vector<8x32xf32>, vector<32x64xf32>, vector<8x64xf32> -> vector<8x64xf32>
    %c0_3 = arith.constant 0 : index
    %c0_4 = arith.constant 0 : index
    %3 = vector.load %arg3[%c0_3, %c0_4] : memref<1x64xf32, #tpu.memory_space<vmem>>, vector<1x64xf32>
    %4 = vector.broadcast %3 : vector<1x64xf32> to vector<8x64xf32>
    %5 = arith.addf %2, %4 : vector<8x64xf32>
    %cst_5 = arith.constant 0.000000e+00 : f32
    %6 = vector.broadcast %cst_5 : f32 to vector<8x64xf32>
    %7 = arith.maximumf %5, %6 : vector<8x64xf32>
    %c0_6 = arith.constant 0 : index
    %c0_7 = arith.constant 0 : index
    %8 = vector.load %arg4[%c0_6, %c0_7] : memref<64x16xf32, #tpu.memory_space<vmem>>, vector<64x16xf32>
    %cst_8 = arith.constant dense<0.000000e+00> : vector<8x16xf32>
    %9 = tpu.matmul %7, %8, %cst_8 {dimension_numbers = #tpu.dot_dimension_numbers<[1], [0], [0], [1], [0, 0, 1, 1], [], []>} : vector<8x64xf32>, vector<64x16xf32>, vector<8x16xf32> -> vector<8x16xf32>
    %c0_9 = arith.constant 0 : index
    %c0_10 = arith.constant 0 : index
    %10 = vector.load %arg5[%c0_9, %c0_10] : memref<1x16xf32, #tpu.memory_space<vmem>>, vector<1x16xf32>
    %11 = vector.broadcast %10 : vector<1x16xf32> to vector<8x16xf32>
    %12 = arith.addf %9, %11 : vector<8x16xf32>
    %c0_11 = arith.constant 0 : index
    %c0_12 = arith.constant 0 : index
    %13 = vector.load %arg6[%c0_11, %c0_12] : memref<8x16xf32, #tpu.memory_space<vmem>>, vector<8x16xf32>
    tpu.vector_store %arg6[%c0_11, %c0_12], %12 {strides = array<i32>} : memref<8x16xf32, #tpu.memory_space<vmem>>, vector<8x16xf32>,
    return
  }
  func.func @transform_0(%arg0: i32) -> (i32, i32) {
    %c0_i32 = arith.constant 0 : i32
    %c0_i32_0 = arith.constant 0 : i32
    return %arg0, %c0_i32 : i32, i32
  }
  func.func @transform_1(%arg0: i32) -> (i32, i32) {
    %c0_i32 = arith.constant 0 : i32
    %c0_i32_0 = arith.constant 0 : i32
    %c0_i32_1 = arith.constant 0 : i32
    return %c0_i32, %c0_i32_0 : i32, i32
  }
  func.func @transform_2(%arg0: i32) -> (i32, i32) {
    %c0_i32 = arith.constant 0 : i32
    %c0_i32_0 = arith.constant 0 : i32
    %c0_i32_1 = arith.constant 0 : i32
    return %c0_i32, %c0_i32_0 : i32, i32
  }
  func.func @transform_3(%arg0: i32) -> (i32, i32) {
    %c0_i32 = arith.constant 0 : i32
    %c0_i32_0 = arith.constant 0 : i32
    %c0_i32_1 = arith.constant 0 : i32
    return %c0_i32, %c0_i32_0 : i32, i32
  }
  func.func @transform_4(%arg0: i32) -> (i32, i32) {
    %c0_i32 = arith.constant 0 : i32
    %c0_i32_0 = arith.constant 0 : i32
    %c0_i32_1 = arith.constant 0 : i32
    return %c0_i32, %c0_i32_0 : i32, i32
  }
  func.func @transform_5(%arg0: i32) -> (i32, i32) {
    %c0_i32 = arith.constant 0 : i32
    %c0_i32_0 = arith.constant 0 : i32
    return %arg0, %c0_i32 : i32, i32
  }
}

</mosaic_0001>

<bundles_post_ra>
// kernel: fc_network_forward.1
= control target key start
LH: loop header
LB: loop body
LE: loop exit
PB: predicated region body
PF: predicated region fallthrough
CT: control target
= control target key end

     0   :  { %s219_s0 = inlined_call_operand.vmem [shape: f32[8,32], index: 0, kind: input, shape index: {}]   ;;  %s220_s1 = inlined_call_operand.vmem [shape: f32[32,64], index: 1, kind: input, shape index: {}]   ;;  %s221_s2 = inlined_call_operand.vmem [shape: f32[1,64], index: 2, kind: input, shape index: {}]   ;;  %s222_s3 = inlined_call_operand.vmem [shape: f32[64,16], index: 3, kind: input, shape index: {}]   ;;  %s223_s4 = inlined_call_operand.vmem [shape: f32[1,16], index: 4, kind: input, shape index: {}]   ;;  %s224_s5 = inlined_call_operand.hbm [shape: f32[8,16], index: 5, kind: output, shape index: {}]  }
   0x1   :  { %v25_v0 = vld [vmem:[%s220_s1 + $0x18] sm:$0xff]  ;;  %v24_v1 = vld [vmem:[%s220_s1 + $0x10] sm:$0xff]  ;;  %v23_v3 = vld [vmem:[%s220_s1 + $0x8] sm:$0xff] }
   0x2   :  { %46 = vmatpush.msra.mxu0 %v25_v0  ;;  %v62_v2 = vld [vmem:[%s222_s3 + $0x38] sm:$0xff]  ;;  %v61_v4 = vld [vmem:[%s222_s3 + $0x30] sm:$0xff]  ;;  %v60_v5 = vld [vmem:[%s222_s3 + $0x28] sm:$0xff] }
   0x3   :  { %79 = vmatpush.msra.mxu1 %v62_v2  ;;  %v22_v6 = vld [vmem:[%s220_s1] sm:$0xff] }
   0x4   :  { %47 = vmatpush.msra.mxu0 %v24_v1 }
   0x5   :  { %80 = vmatpush.msra.mxu1 %v61_v4 }
   0x6   :  { %10 = vsyncpa [#allocation3], 0  ;;  %48 = vmatpush.msra.mxu0 %v23_v3  ;;  %v21_v7 = vld [vmem:[%s219_s0] sm:$0xff]  ;;  %vm30_vm0 = vcmask 261120   ;;  %v58_v9 = vld [vmem:[%s222_s3 + $0x18] sm:$0xff]  ;;  %vm67_vm1 = vcmask 523264  }
   0x7   :  { %v59_v8 = vld [vmem:[%s222_s3 + $0x20] sm:$0xff]  ;;  %81 = vmatpush.msra.mxu1 %v60_v5  ;;  %v57_v10 = vld [vmem:[%s222_s3 + $0x10] sm:$0xff]  ;;  %v56_v11 = vld [vmem:[%s222_s3 + $0x8] sm:$0xff]  ;;  %s140_s21 = smov [#allocation2]   ;;  %vm91_vm2 = vcmask 130048  }
   0x8   :  { %49 = vmatpush.msra.mxu0 %v22_v6  ;;  %v55_v12 = vld [vmem:[%s222_s3] sm:$0xff]  ;;  %s98_s22 = sshll.u32 %s140_s21, 4  ;;  %s100_s3 = sshll.u32 %s224_s5, 4  ;;  %s99_s22 = int_to_ptr.vmem [resolvable:$true] %s98_s22  ;;  %s101_s3 = int_to_ptr.hbm [resolvable:$true] %s100_s3 }
   0x9   :  { %109 = vmatmul.msk.f32.vlgmr.msra.gmra.mxu0 %vm30_vm0, %v21_v7  ;;  %82 = vmatpush.msra.mxu1 %v59_v8  ;;  %v112_v13 = vld [vmem:[%s221_s2] ss:$0 sm:$0xff] }
   0xa   :  { %v113_v17 = vld [vmem:[%s223_s4] ss:$0 sm:$0xff] }
   0xb   :  { %83 = vmatpush.msra.mxu1 %v58_v9 }
   0xd   :  { %84 = vmatpush.msra.mxu1 %v57_v10 }
   0xf   :  { %85 = vmatpush.msra.mxu1 %v56_v11 }
  0x11   :  { %86 = vmatpush.msra.mxu1 %v55_v12 }
  0x86   :  { %v51_v14 = vpop.f32.mrf.mxu0 }
  0x87   :  { %v52_v15 = vadd.f32 %v112_v13, %v51_v14 }
  0x89   :  { %v54_v16 = vmax.f32 %v52_v15, 0.0 }
  0x8b   :  { %110 = vmatmul.msk.f32.vlgmr.msra.gmra.mxu1 %vm67_vm1, %v54_v16 }
 0x108   :  { %v88_v18 = vpop.f32.mrf.mxu1 }
 0x109   :  { %v89_v19 = vadd.f32 %v113_v17, %v88_v18 }
 0x10b   :  { %92 = vst.msk [vmem:[#allocation2] sm:$0xff] %vm91_vm2, %v89_v19 }
 0x10c   :  { %103 = dma.vmem_to_hbm [thread:$0]  %s99_s22, 128, %s101_s3, [#allocation3]  }
 0x10d   :  { %138 = dma.done.wait [#allocation3], 128  }
 0x10e   :  { %139 = vsyncadd [#allocation3], 4294967168 }
 0x10f   :  { %108 = vsyncpa [#allocation3], 1 }

</bundles_post_ra>
